<compile_context>
chip_gen: v7x
topology: tpu7x:2x2x1
jax: 0.10.0
libtpu: 0.0.40
codegen_flags: <defaults>
</compile_context>

<pallas_src>
import functools

import jax
import jax.numpy as jnp
from jax.experimental import pallas as pl
from jax.experimental.pallas import tpu as pltpu


def pack_attention_params(W, b, v):
    """One-time packing of the attention parameters into a single (2H+2, H) f32 slab.

    Rows [:H]     = W[:, :H].T  (hidden half of the attn Linear)
    Rows [H:2H]   = W[:, H:].T  (encoder half)
    Row  [2H]     = bias
    Row  [2H+1]   = v
    Call ONCE at module init, not per decoder step (review item 1).
    """
    return jnp.concatenate([W.T, b[None, :], v[None, :]], axis=0).astype(jnp.float32)


def _attention_kernel(h_ref, enc_ref, p_ref, out_ref, *, B, T, H, mxu_dtype):
    # h_ref:   (1, B, H)  -- only the LAST decoder layer (selected by BlockSpec index_map)
    # enc_ref: (B, T, H)
    # p_ref:   (2H+2, H)  -- packed [W_hid.T ; W_enc.T ; bias ; v]
    h = h_ref[0]                               # (B, H)
    # Free sublane regroup because T % 8 == 0 (see production note at top for general T).
    enc = enc_ref[...].reshape(B * T, H)       # (B*T, H)

    w1t = p_ref[:H, :]                         # (H, H)  hidden half of W.T
    w2t = p_ref[H:2 * H, :]                    # (H, H)  encoder half of W.T
    bias = p_ref[2 * H:2 * H + 1, :]           # (1, H)
    vvec = p_ref[2 * H + 1:2 * H + 2, :]       # (1, H)

    # Hidden projection with the Linear bias folded in on (B,H), not (B,T,H).
    hp = jnp.dot(h.astype(mxu_dtype), w1t.astype(mxu_dtype),
                 preferred_element_type=jnp.float32) + bias          # (B, H)  f32

    # Encoder projection as ONE flat 2-D MXU matmul (no batched einsum).
    # (Fusing both dots into a single (B*T,2H)@(2H,H) would save one MXU issue at these
    #  tiny sizes but costs T x extra flops on the hidden half at production T -- keep split.)
    ep = jnp.dot(enc.astype(mxu_dtype), w2t.astype(mxu_dtype),
                 preferred_element_type=jnp.float32)                 # (B*T, H) f32

    # energy = tanh(W [h ; enc] + b); epilogue kept f32 (v5e has no bf16 VPU/EUP).
    energy = jnp.tanh(ep.reshape(B, T, H) + hp[:, None, :])          # (B, T, H)

    # scores_{b,t} = v . energy_{b,t}: VPU mul + lane reduce (at H=32, B*T=16 the MXU
    # route would need an extra cross-lane relayout that costs more than this reduce).
    scores = jnp.sum(energy * vvec[None, :, :], axis=-1)             # (B, T)

    # softmax over T (PyTorch: F.softmax(attn_energies, dim=1)).
    # approx=False: exact normalization, still on the EUP slot (off the VALU critical path).
    m = jnp.max(scores, axis=1, keepdims=True)
    e = jnp.exp(scores - m)
    denom = jnp.sum(e, axis=1, keepdims=True)
    out_ref[...] = (e * pl.reciprocal(denom, approx=False)).astype(out_ref.dtype)


def attention_forward(hidden, encoder_outputs, packed_params, *, mxu_dtype=jnp.bfloat16):
    """hidden: (L,B,H); encoder_outputs: (B,T,H); packed_params: (2H+2,H). Returns (B,T)."""
    L, B, H = hidden.shape
    _, T, _ = encoder_outputs.shape

    kernel = functools.partial(_attention_kernel, B=B, T=T, H=H, mxu_dtype=mxu_dtype)

    # Single grid point: the whole working set is a few KB and fully VMEM-resident.
    # At production sizes: grid over B / B*T row tiles marked "parallel" (v7x 2 TCs),
    # 256-multiple MXU tiles on v6e/v7x (128 on v5e), enc tile sized for 64 MiB VMEM on
    # v7x, and a lane-dense (>=128-wide) output by batching steps/heads into one call.
    return pl.pallas_call(
        kernel,
        out_shape=jax.ShapeDtypeStruct((B, T), jnp.float32),
        grid=(1,),
        in_specs=[
            # Only the last decoder layer is DMA'd HBM->VMEM: no wrapper slice op.
            pl.BlockSpec((1, B, H), lambda i: (L - 1, 0, 0)),
            pl.BlockSpec((B, T, H), lambda i: (0, 0, 0)),
            pl.BlockSpec((2 * H + 2, H), lambda i: (0, 0)),
        ],
        out_specs=pl.BlockSpec((B, T), lambda i: (0, 0)),
        compiler_params=pltpu.CompilerParams(
            dimension_semantics=("arbitrary",)),   # mark real B/row axes "parallel" on v7x
    )(hidden, encoder_outputs, packed_params)


if __name__ == "__main__":
    key = jax.random.PRNGKey(0)
    H, B, T, L = 32, 2, 8, 2
    k1, k2, k3, k4, k5 = jax.random.split(key, 5)

    # deterministic synthetic inputs / parameters (mimic nn.Linear + normal(0, 1/sqrt(H)) init)
    hidden = jax.random.normal(k1, (L, B, H), dtype=jnp.float32)
    encoder_outputs = jax.random.normal(k2, (B, T, H), dtype=jnp.float32)

    bound = 1.0 / float(jnp.sqrt(2.0 * H))
    W = jax.random.uniform(k3, (H, 2 * H), minval=-bound, maxval=bound,
                           dtype=jnp.float32)      # attn.weight (out=H, in=2H)
    b = jax.random.uniform(k4, (H,), minval=-bound, maxval=bound,
                           dtype=jnp.float32)      # attn.bias
    v = (1.0 / float(jnp.sqrt(H))) * jax.random.normal(k5, (H,), dtype=jnp.float32)

    # Parameter packing done ONCE at init (hoisted out of the per-step forward).
    params = jax.block_until_ready(pack_attention_params(W, b, v))

    fwd_f32 = jax.jit(functools.partial(attention_forward, mxu_dtype=jnp.float32))
    fwd_bf16 = jax.jit(functools.partial(attention_forward, mxu_dtype=jnp.bfloat16))

    # pure-JAX reference (mirrors the PyTorch forward exactly)
    h_last = hidden[-1]                                          # (B, H)
    cat = jnp.concatenate(
        [jnp.broadcast_to(h_last[:, None, :], (B, T, H)), encoder_outputs], axis=-1)
    energy_ref = jnp.tanh(cat @ W.T + b)                         # (B, T, H)
    scores_ref = energy_ref @ v                                  # (B, T)
    ref = jax.nn.softmax(scores_ref, axis=1)

    # Exact-path check (f32 MXU feed, exact reciprocal).
    out_f32 = jax.block_until_ready(fwd_f32(hidden, encoder_outputs, params))
    assert out_f32.shape == (B, T)
    assert jnp.allclose(out_f32, ref, atol=1e-3, rtol=1e-3), \
        float(jnp.max(jnp.abs(out_f32 - ref)))

    # Default fast path (bf16 MXU feed per v6e/v7x review, f32 accumulation/epilogue).
    out_bf16 = jax.block_until_ready(fwd_bf16(hidden, encoder_outputs, params))
    assert out_bf16.shape == (B, T)
    assert jnp.allclose(out_bf16, ref, atol=5e-3, rtol=5e-3), \
        float(jnp.max(jnp.abs(out_bf16 - ref)))

    print("KERNEL_OK")
</pallas_src>

<mosaic_0001>
module attributes {stable_mosaic.version = 11 : i64} {
  func.func @_attention_kernel(%arg0: i32, %arg1: memref<1x2x32xf32, #tpu.memory_space<vmem>>, %arg2: memref<2x8x32xf32, #tpu.memory_space<vmem>>, %arg3: memref<66x32xf32, #tpu.memory_space<vmem>>, %arg4: memref<2x8xf32, #tpu.memory_space<vmem>>) attributes {dimension_semantics = [#tpu.dimension_semantics<arbitrary>], iteration_bounds = array<i64: 1>, scalar_prefetch = 0 : i64, scratch_operands = 0 : i64, tpu.core_type = #tpu.core_type<tc>, window_params = [{transform_indices = @transform_0, window_bounds = array<i64: 1, 2, 32>}, {pipeline_mode = #tpu.pipeline_mode<synchronous>, transform_indices = @transform_1, window_bounds = array<i64: 2, 8, 32>}, {pipeline_mode = #tpu.pipeline_mode<synchronous>, transform_indices = @transform_2, window_bounds = array<i64: 66, 32>}, {pipeline_mode = #tpu.pipeline_mode<synchronous>, transform_indices = @transform_3, window_bounds = array<i64: 2, 8>}]} {
    %c0 = arith.constant 0 : index
    %c0_0 = arith.constant 0 : index
    %c0_1 = arith.constant 0 : index
    %0 = vector.load %arg1[%c0, %c0_0, %c0_1] : memref<1x2x32xf32, #tpu.memory_space<vmem>>, vector<1x2x32xf32>
    %1 = vector.shape_cast %0 : vector<1x2x32xf32> to vector<2x32xf32>
    %c0_2 = arith.constant 0 : index
    %c0_3 = arith.constant 0 : index
    %c0_4 = arith.constant 0 : index
    %2 = vector.load %arg2[%c0_2, %c0_3, %c0_4] : memref<2x8x32xf32, #tpu.memory_space<vmem>>, vector<2x8x32xf32>
    %3 = vector.shape_cast %2 : vector<2x8x32xf32> to vector<16x32xf32>
    %c0_5 = arith.constant 0 : index
    %c0_6 = arith.constant 0 : index
    %4 = vector.load %arg3[%c0_5, %c0_6] : memref<66x32xf32, #tpu.memory_space<vmem>>, vector<32x32xf32>
    %c32 = arith.constant 32 : index
    %c0_7 = arith.constant 0 : index
    %5 = vector.load %arg3[%c32, %c0_7] : memref<66x32xf32, #tpu.memory_space<vmem>>, vector<32x32xf32>
    %c64 = arith.constant 64 : index
    %c0_8 = arith.constant 0 : index
    %6 = vector.load %arg3[%c64, %c0_8] : memref<66x32xf32, #tpu.memory_space<vmem>>, vector<1x32xf32>
    %c65 = arith.constant 65 : index
    %c0_9 = arith.constant 0 : index
    %7 = vector.load %arg3[%c65, %c0_9] : memref<66x32xf32, #tpu.memory_space<vmem>>, vector<1x32xf32>
    %cst = arith.constant dense<0.000000e+00> : vector<2x32xf32>
    %8 = tpu.matmul %1, %4, %cst {dimension_numbers = #tpu.dot_dimension_numbers<[1], [0], [0], [1], [0, 0, 1, 1], [], []>} : vector<2x32xf32>, vector<32x32xf32>, vector<2x32xf32> -> vector<2x32xf32>
    %9 = vector.broadcast %6 : vector<1x32xf32> to vector<2x32xf32>
    %10 = arith.addf %8, %9 : vector<2x32xf32>
    %cst_10 = arith.constant dense<0.000000e+00> : vector<16x32xf32>
    %11 = tpu.matmul %3, %5, %cst_10 {dimension_numbers = #tpu.dot_dimension_numbers<[1], [0], [0], [1], [0, 0, 1, 1], [], []>} : vector<16x32xf32>, vector<32x32xf32>, vector<16x32xf32> -> vector<16x32xf32>
    %12 = vector.shape_cast %11 : vector<16x32xf32> to vector<2x8x32xf32>
    %13 = vector.shape_cast %10 : vector<2x32xf32> to vector<2x1x32xf32>
    %14 = vector.broadcast %13 : vector<2x1x32xf32> to vector<2x8x32xf32>
    %15 = arith.addf %12, %14 : vector<2x8x32xf32>
    %16 = math.tanh %15 : vector<2x8x32xf32>
    %17 = vector.shape_cast %7 : vector<1x32xf32> to vector<1x1x32xf32>
    %18 = vector.broadcast %17 : vector<1x1x32xf32> to vector<2x8x32xf32>
    %19 = arith.mulf %16, %18 : vector<2x8x32xf32>
    %cst_11 = arith.constant dense<0.000000e+00> : vector<2x8xf32>
    %20 = vector.multi_reduction <add>, %19, %cst_11 [2] : vector<2x8x32xf32> to vector<2x8xf32>
    %cst_12 = arith.constant dense<0xFF800000> : vector<2xf32>
    %21 = vector.multi_reduction <maximumf>, %20, %cst_12 [1] : vector<2x8xf32> to vector<2xf32>
    %22 = vector.shape_cast %21 : vector<2xf32> to vector<2x1xf32>
    %23 = vector.broadcast %22 : vector<2x1xf32> to vector<2x8xf32>
    %24 = arith.subf %20, %23 : vector<2x8xf32>
    %25 = math.exp %24 : vector<2x8xf32>
    %cst_13 = arith.constant dense<0.000000e+00> : vector<2xf32>
    %26 = vector.multi_reduction <add>, %25, %cst_13 [1] : vector<2x8xf32> to vector<2xf32>
    %27 = vector.shape_cast %26 : vector<2xf32> to vector<2x1xf32>
    %28 = tpu.reciprocal %27 : vector<2x1xf32> -> vector<2x1xf32>
    %29 = vector.broadcast %28 : vector<2x1xf32> to vector<2x8xf32>
    %30 = arith.mulf %25, %29 : vector<2x8xf32>
    %c0_14 = arith.constant 0 : index
    %c0_15 = arith.constant 0 : index
    %31 = vector.load %arg4[%c0_14, %c0_15] : memref<2x8xf32, #tpu.memory_space<vmem>>, vector<2x8xf32>
    tpu.vector_store %arg4[%c0_14, %c0_15], %30 {strides = array<i32>} : memref<2x8xf32, #tpu.memory_space<vmem>>, vector<2x8xf32>,
    return
  }
  func.func @transform_0(%arg0: i32) -> (i32, i32, i32) {
    %c1_i32 = arith.constant 1 : i32
    %c0_i32 = arith.constant 0 : i32
    %c0_i32_0 = arith.constant 0 : i32
    %c0_i32_1 = arith.constant 0 : i32
    return %c1_i32, %c0_i32, %c0_i32_0 : i32, i32, i32
  }
  func.func @transform_1(%arg0: i32) -> (i32, i32, i32) {
    %c0_i32 = arith.constant 0 : i32
    %c0_i32_0 = arith.constant 0 : i32
    %c0_i32_1 = arith.constant 0 : i32
    %c0_i32_2 = arith.constant 0 : i32
    return %c0_i32, %c0_i32_0, %c0_i32_1 : i32, i32, i32
  }
  func.func @transform_2(%arg0: i32) -> (i32, i32) {
    %c0_i32 = arith.constant 0 : i32
    %c0_i32_0 = arith.constant 0 : i32
    %c0_i32_1 = arith.constant 0 : i32
    return %c0_i32, %c0_i32_0 : i32, i32
  }
  func.func @transform_3(%arg0: i32) -> (i32, i32) {
    %c0_i32 = arith.constant 0 : i32
    %c0_i32_0 = arith.constant 0 : i32
    %c0_i32_1 = arith.constant 0 : i32
    return %c0_i32, %c0_i32_0 : i32, i32
  }
}

</mosaic_0001>

<bundles_post_ra>
// kernel: attention_forward.1
= control target key start
LH: loop header
LB: loop body
LE: loop exit
PB: predicated region body
PF: predicated region fallthrough
CT: control target
= control target key end

     0   :  { %v438_v3 = vmov 0.0|0.0   ;;  %vm439_vm0 = vmmov 0   ;;  %v440_v8 = vmov 0.0   ;;  %vm35_vm1 = vcmask 261120   ;;  %s532_s0 = inlined_call_operand.vmem [shape: f32[2,2,32], index: 0, kind: input, shape index: {}]   ;;  %s533_s1 = inlined_call_operand.vmem [shape: f32[2,8,32], index: 1, kind: input, shape index: {}]   ;;  %s534_s2 = inlined_call_operand.vmem [shape: f32[66,32], index: 2, kind: input, shape index: {}]   ;;  %s535_s3 = inlined_call_operand.hbm [shape: f32[2,8], index: 3, kind: output, shape index: {}]  }
   0x1   :  { %v21_v0 = vld [vmem:[%s534_s2] sm:$0xff]  ;;  %v22_v1 = vld [vmem:[%s534_s2 + $0x8] sm:$0xff]  ;;  %v23_v2 = vld [vmem:[%s534_s2 + $0x10] sm:$0xff]  ;;  %382 = vmatprep.subr.bf16.mxu0 %v438_v3  ;;  %368 = vmatprep.mubr.msk.f32.mxu0 %vm439_vm0, %v440_v8 }
   0x2   :  { %v383_v4 = vpack.c.bf16 %v22_v1, %v21_v0  ;;  %v24_v5 = vld [vmem:[%s534_s2 + $0x18] sm:$0xff]  ;;  %v25_v6 = vld [vmem:[%s534_s2 + $0x20] sm:$0xff]  ;;  %v26_v7 = vld [vmem:[%s534_s2 + $0x28] sm:$0xff] }
   0x3   :  { %v388_v9 = vpack.c.bf16 %v26_v7, %v25_v6  ;;  %v27_v10 = vld [vmem:[%s534_s2 + $0x30] sm:$0xff]  ;;  %v28_v11 = vld [vmem:[%s534_s2 + $0x38] sm:$0xff]  ;;  %v386_v12 = vpack.c.bf16 %v24_v5, %v23_v2  ;;  %v19_v14 = vld [vmem:[%s533_s1] sm:$0xff] }
   0x4   :  { %384 = vmatpush3.bf16.msra.mxu0 %v383_v4  ;;  %v392_v13 = vpack.c.bf16 %v28_v11, %v27_v10 }
   0x5   :  { %385 = vmatprep.subr.bf16.mxu0 %v438_v3  ;;  %389 = vmatprep.subr.bf16.mxu1 %v388_v9 }
   0x6   :  { %8 = vsyncpa [#allocation3], 0  ;;  %391 = vmatpush3.bf16.msra.mxu1 %v388_v9  ;;  %379 = vmatprep.mubr.msk.f32.mxu1 %vm35_vm1, %v19_v14  ;;  %v343_v15 = vld [vmem:[%s532_s0 + $0x2] sm:$0x3]  ;;  %v20_v16 = vld [vmem:[%s533_s1 + $0x8] sm:$0xff]  ;;  %v194_v19 = vlaneseq  ;;  %vm251_vm2 = vcmask 1041409  }
   0x7   :  { %393 = vmatprep.subr.bf16.mxu1 %v392_v13  ;;  %v441_v17 = vmov 1966171168   ;;  %v344_v22 = vld [vmem:[%s534_s2 + $0x40] ss:$0 sm:$0xff]  ;;  %v348_v38 = vld [vmem:[%s534_s2 + $0x41] ss:$0 sm:$0xff] }
   0x8   :  { %387 = vmatpush3.bf16.msra.mxu0 %v386_v12  ;;  %v192_v18 = vunpack.c.l.s4 %v441_v17  ;;  %v500_v21 = vshrl.u32 %v194_v19, 7  ;;  %v242_v45 = vand.u32 127, %v194_v19  ;;  %vm254_vm3 = vcmask 58368   ;;  %s443_s2 = smov [#allocation2]  }
   0x9   :  { %v442_v53 = vmov 0   ;;  %s335_s9 = sshll.u32 %s443_s2, 4  ;;  %s336_s9 = int_to_ptr.vmem [resolvable:$true] %s335_s9 }
   0xa   :  { %395 = vmatpush3.bf16.msra.mxu1 %v392_v13  ;;  %v193_v20 = vunpack.c.0.s8 %v192_v18  ;;  %v215_v29 = vsub.s32 0, %v500_v21  ;;  %v245_v47 = vsub.s32 %v242_v45, %v500_v21  ;;  %403 = vset.pattern.permute.xlu0 %v442_v53  ;;  %v265_v54 = vsub.s32 1, %v500_v21  ;;  %s414_s10 = scalar_lea.vmem %s336_s9, 32  ;;  %p419_p1 = scmp.lt.s32.totalorder %s336_s9, %s336_s9 }
   0xb   :  { %369 = vmatmul.mubr.msk.f32.vlgmr.msra.gmra.mrb[0].mxu0 %vm35_vm1, %v343_v15  ;;  %402 = vset.pattern.permute.xlu1 %v442_v53  ;;  %p415_p0 = scmp.ne.s32.totalorder %s336_s9, %s414_s10  ;;  %p420_p2 = scmp.lt.s32.totalorder %s414_s10, %s414_s10 }
   0xc   :  { %v196_v23 = vsub.s32 %v193_v20, %v500_v21 }
   0xd   :  { %380 = vmatmul.mubr.msk.f32.vlgmr.msra.gmra.mrb[0].mxu1 %vm35_vm1, %v20_v16  ;;  %p421_p3 = por %p420_p2, %p419_p1 }
   0xf   :  { %p422_p4 = pnand %p421_p3, %p415_p0 }
  0xde   :  { %v105_v24 = vpop.f32.mrb[0].mxu0 }
  0xdf   :  { %v106_v25 = vadd.f32 %v344_v22, %v105_v24  ;;  %v370_v26 = vpop.f32.mrb[1].mxu0 }
  0xe0   :  { %v381_v27 = vpop.f32.mrb[0].mxu1 }
  0xe1   :  { %v197_v28 = vrot.slane %v106_v25, %v196_v23  ;;  %v181_v30 = vpop.f32.mrb[1].mxu1 }
  0xe3   :  { %v198_v31 = vcombine.high %v197_v28, %v197_v28  ;;  %v205_v32 = vrot.slane %v197_v28, %v196_v23 }
  0xe5   :  { %v212_v33 = vrot.slane %v198_v31, %v196_v23  ;;  %v216_v34 = vrot.slane %v205_v32, %v215_v29 }
  0xe7   :  { %v220_v35 = vrot.slane %v212_v33, %v215_v29  ;;  %v223_v36 = vadd.f32 %v216_v34, %v181_v30 }
  0xe9   :  { %v224_v37 = vadd.f32 %v381_v27, %v220_v35  ;;  %404 = vtanh.f32 %v223_v36 }
  0xeb   :  { %406 = vtanh.f32 %v224_v37 }
  0xf3   :  { %v405_v39 = vpop.eup %404 }
  0xf4   :  { %v231_v40 = vmul.f32 %v405_v39, %v348_v38 }
  0xf5   :  { %v407_v41 = vpop.eup %406 }
  0xf6   :  { %v233_v42 = vsel %vm35_vm1, %v231_v40, 0.0  ;;  %v232_v43 = vmul.f32 %v407_v41, %v348_v38 }
  0xf7   :  { %234 = vadd.xlane.f32.xlu0 %v233_v42 }
  0xf8   :  { %v236_v44 = vsel %vm35_vm1, %v232_v43, 0.0 }
  0xfb   :  { %237 = vadd.xlane.f32.xlu0 %v236_v44 }
 0x184   :  { %v235_v46 = vpop.xlane.xlu0 %234 }
 0x185   :  { %v246_v49 = vrot.slane %v235_v46, %v245_v47 }
 0x188   :  { %v238_v48 = vpop.xlane.xlu0 %237 }
 0x189   :  { %v250_v50 = vrot.slane %v238_v48, %v245_v47 }
 0x18b   :  { %v252_v51 = vsel %vm251_vm2, %v250_v50, %v246_v49 }
 0x18c   :  { %v255_v52 = vsel %vm254_vm3, %v252_v51, -inf }
 0x18d   :  { %256 = vmax.xlane.f32.xlu1 %v255_v52 }
 0x21a   :  { %v257_v55 = vpop.xlane.xlu1 %256 }
 0x21b   :  { %v262_v56 = vrot.slane %v257_v55, %v215_v29  ;;  %v266_v57 = vrot.slane %v257_v55, %v265_v54 }
 0x21d   :  { %v269_v58 = vsub.f32 %v235_v46, %v262_v56  ;;  %v270_v59 = vsub.f32 %v238_v48, %v266_v57 }
 0x21f   :  { %v271_v60 = vmul.f32 1.442695, %v269_v58  ;;  %v273_v61 = vmul.f32 1.442695, %v270_v59 }
 0x221   :  { %408 = vpow2.f32 %v271_v60 }
 0x222   :  { %410 = vpow2.f32 %v273_v61 }
 0x22b   :  { %v409_v62 = vpop.eup %408 }
 0x22c   :  { %v411_v63 = vpop.eup %410  ;;  %278 = vperm.xlu1 %402, %v409_v62  }
 0x22d   :  { %281 = vperm.xlu0 %403, %v411_v63  }
 0x2ab   :  { %v279_v0 = vpop.permute.xlu1 %278 }
 0x2ac   :  { %v282_v1 = vpop.permute.xlu0 %281  ;;  %v286_v2 = vrot.slane %v279_v0, %v245_v47 }
 0x2ad   :  { %v290_v3 = vrot.slane %v282_v1, %v245_v47 }
 0x2af   :  { %v291_v4 = vsel %vm251_vm2, %v290_v3, %v286_v2 }
 0x2b0   :  { %v293_v5 = vsel %vm254_vm3, %v291_v4, 0.0 }
 0x2b1   :  { %294 = vadd.xlane.f32.xlu1 %v293_v5 }
 0x33e   :  { %v295_v6 = vpop.xlane.xlu1 %294 }
 0x33f   :  { %412 = vrcp.f32 %v295_v6 }
 0x349   :  { %v413_v7 = vpop.eup %412 }
 0x34a   :  { %v301_v8 = vrot.slane %v413_v7, %v215_v29  ;;  %v305_v10 = vrot.slane %v413_v7, %v265_v54 }
 0x34c   :  { %v308_v9 = vmul.f32 %v409_v62, %v301_v8  ;;  %v309_v11 = vmul.f32 %v411_v63, %v305_v10 }
 0x34e   :  { %313 = vperm.xlu0 %403, %v308_v9  }
 0x352   :  { %316 = vperm.xlu0 %403, %v309_v11  }
 0x3cd   :  { %v314_v12 = vpop.permute.xlu0 %313 }
 0x3ce   :  { %v321_v14 = vrot.slane %v314_v12, %v245_v47 }
 0x3d1   :  { %v317_v13 = vpop.permute.xlu0 %316 }
 0x3d2   :  { %v325_v15 = vrot.slane %v317_v13, %v245_v47 }
 0x3d4   :  { %v326_v16 = vsel %vm251_vm2, %v325_v15, %v321_v14 }
 0x3d5   :  { %328 = vst.msk [vmem:[#allocation2] sm:$0x3] %vm254_vm3, %v326_v16 }
 0x3d6   :  { %425 = shalt.err (!%p422_p4)
}
 0x3d7   :  { %s426_s13 = scalar_lea.hbm %s535_s3, 32 }
 0x3d8   :  { %p427_p5 = scmp.ne.s32.totalorder %s535_s3, %s426_s13  ;;  %p430_p6 = scmp.lt.u32.totalorder %s426_s13, %s535_s3 }
 0x3da   :  { %p432_p7 = pnand %p430_p6, %p427_p5 }
 0x3dc   :  { %435 = shalt.err (!%p432_p7)
}
 0x3dd   :  { %338 = dma.vmem_to_hbm [thread:$0]  %s336_s9, 32, %s535_s3, [#allocation3]  }
 0x3de   :  { %436 = dma.done.wait [#allocation3], 32  }
 0x3df   :  { %437 = vsyncadd [#allocation3], 4294967264 }
 0x3e0   :  { %342 = vsyncpa [#allocation3], 1 }

</bundles_post_ra>
